<compile_context>
chip_gen: v6e
topology: v6e:2x2x1
jax: 0.10.0
libtpu: 0.0.40
codegen_flags: <defaults>
</compile_context>

<pallas_src>
import functools

import jax
import jax.numpy as jnp
from jax import lax
from jax.experimental import pallas as pl
from jax.experimental.pallas import tpu as pltpu

K_SIZE = 4          # lifting kernel_size (k_size)
K2 = 2              # second conv kernel size inside each branch
PAD = K_SIZE // 2   # pad used by Reflection/ReplicationPad1d
HIDDEN = 4          # size_hidden in LiftingScheme
BN_EPS = 1e-5


def _ceil8(n):
    return ((n + 7) // 8) * 8


# ---------------------------------------------------------------------------
# Pallas kernel: whole LevelWASN forward for a block of BB batch elements.
# Layout: (padded channels C8, BB*Tseg lanes); each batch element owns a
# contiguous segment of Tseg = Th + 2*PAD lanes, raw data at offset PAD.
# ---------------------------------------------------------------------------
def level_wasn_kernel(
    x_ref,                                  # (2, C8, Lw): even / odd samples
    seg_ref,                                # (C8, Lw) int32: lane position within segment
    w1a_ref, b1a_ref, w2a_ref, b2a_ref,     # fused phi + P   (stage 1)
    w1b_ref, b1b_ref, w2b_ref, b2b_ref,     # fused psi + U   (stage 2)
    bn_a_ref, bn_b_ref,                     # folded BatchNorm1d scale / shift, (C8, 1)
    out_ref, det_ref,
    *, Th,
):
    C8 = out_ref.shape[0]
    Lw = out_ref.shape[1]
    R1 = w1a_ref.shape[0]
    f32 = jnp.float32

    xe = x_ref[0]                           # (C8, Lw)
    xo = x_ref[1]
    seg = seg_ref[...]                      # (C8, Lw) int32

    # Hoisted boundary-column masks (reused by every pad below).
    mL = [seg == j for j in range(PAD)]                     # left pad columns
    mR = [seg == (PAD + Th + j) for j in range(PAD)]        # right pad columns
    row1 = lax.broadcasted_iota(jnp.int32, (R1, Lw), 0)     # reused for both stages

    def roller(v):
        # Cached lane rolls (XLU slot) of a (rows, Lw) array.
        cache = {}
        def get(s):
            s = s % Lw
            if s == 0:
                return v
            if s not in cache:
                cache[s] = pltpu.roll(v, s, axis=1)
            return cache[s]
        return get

    r_xe = roller(xe)
    r_xo = roller(xo)

    # --- padding of x_even: raw data sits at segment cols [PAD, PAD+Th) ------
    # replication (for phi) and reflection (for P): boundary-column selects of
    # rolled copies; interior columns are already in place.
    xe_rep = xe
    xe_refl = xe
    for j in range(PAD):
        xe_rep = jnp.where(mL[j], r_xe(j - PAD), xe_rep)          # x[0]
        xe_rep = jnp.where(mR[j], r_xe(j + 1), xe_rep)            # x[Th-1]
        xe_refl = jnp.where(mL[j], r_xe(2 * j - 2 * PAD), xe_refl)  # x[PAD-j]
        xe_refl = jnp.where(mR[j], r_xe(2 * j + 2), xe_refl)        # x[Th-2-j]

    def first_conv(srcs, w_ref, b_ref):
        # im2col via tap rolls; 8-aligned stacking; one MXU matmul.
        blocks = []
        for s in srcs:
            rs = roller(s)
            for k in range(K_SIZE):
                blocks.append(rs(-k))
        slab = jnp.concatenate(blocks, axis=0)
        h = jnp.dot(w_ref[...], slab.astype(w_ref.dtype),
                    preferred_element_type=f32) + b_ref[...]
        # ReLU only on the P/U rows (rows >= C8); phi/psi rows pass through
        # (Dropout = identity in eval mode).
        return jnp.where(row1 < C8, h, jnp.maximum(h, 0.0))

    def second_conv(h, w_ref, b_ref):
        rh = roller(h)
        slab = jnp.concatenate([h, rh(-1)], axis=0)
        return jnp.tanh(jnp.dot(w_ref[...], slab.astype(w_ref.dtype),
                                preferred_element_type=f32) + b_ref[...])

    # --- stage 1: d = x_odd * exp(phi(x_even)) - P(x_even) -------------------
    h1 = first_conv([xe_rep, xe_refl], w1a_ref, b1a_ref)    # (R1, Lw)
    o1 = second_conv(h1, w2a_ref, b2a_ref)                  # (2*C8, Lw): [phi ; P]
    xo_al = r_xo(-PAD)                                      # x_odd at segment cols [0, Th)
    d = xo_al * jnp.exp(o1[:C8]) - o1[C8:]                  # valid cols [0, Th)

    # --- stage 2: c = x_even * exp(psi(d)) + U(d) ----------------------------
    # replication pad of d (valid at segment cols [0, Th)) done in-place.
    r_d = roller(d)
    d_pad = r_d(PAD)
    for j in range(PAD):
        d_pad = jnp.where(mL[j], r_d(j), d_pad)                 # d[0]
        d_pad = jnp.where(mR[j], r_d(PAD + 1 + j), d_pad)       # d[Th-1]
    h2 = first_conv([d_pad], w1b_ref, b1b_ref)
    o2 = second_conv(h2, w2b_ref, b2b_ref)                      # [psi ; U]
    xe_al = r_xe(-PAD)
    c = xe_al * jnp.exp(o2[:C8]) + o2[C8:]

    # --- bottleneck (no_bottleneck=True => disable_conv): ReLU(BN(c)) --------
    out_ref[...] = jnp.maximum(c * bn_a_ref[...] + bn_b_ref[...], 0.0)
    det_ref[...] = d


# ---------------------------------------------------------------------------
# Weight fusion (wrapper-side, pure JAX, tiny), 8-sublane-aligned groups.
# ---------------------------------------------------------------------------
def _fuse_params(params, C, matmul_dtype):
    C8 = _ceil8(C)
    CH = HIDDEN * C
    CH8 = _ceil8(CH)
    R1 = C8 + CH8            # fused first-conv rows: [phi|psi (pad->C8) ; P|U (pad->CH8)]
    R2 = 2 * C8              # fused second-conv rows: [phi|psi (pad->C8) ; P|U (pad->C8)]

    def first_w(top_w, bot_w, n_src, top_src, bot_src):
        # slab column = src*K*C8 + k*C8 + c
        w = jnp.zeros((R1, n_src * K_SIZE * C8), jnp.float32)
        for k in range(K_SIZE):
            ct = top_src * K_SIZE * C8 + k * C8
            cb = bot_src * K_SIZE * C8 + k * C8
            w = w.at[:C, ct:ct + C].set(top_w[:, :, k])
            w = w.at[C8:C8 + CH, cb:cb + C].set(bot_w[:, :, k])
        return w

    def first_b(top_b, bot_b):
        b = jnp.zeros((R1,), jnp.float32).at[:C].set(top_b).at[C8:C8 + CH].set(bot_b)
        return b[:, None]

    def second_w(top_w, bot_w):
        # slab column = kk*R1 + hidden_row
        w = jnp.zeros((R2, K2 * R1), jnp.float32)
        for kk in range(K2):
            w = w.at[:C, kk * R1:kk * R1 + C].set(top_w[:, :, kk])
            w = w.at[C8:C8 + C, kk * R1 + C8:kk * R1 + C8 + CH].set(bot_w[:, :, kk])
        return w

    def second_b(top_b, bot_b):
        b = jnp.zeros((R2,), jnp.float32).at[:C].set(top_b).at[C8:C8 + C].set(bot_b)
        return b[:, None]

    # Stage 1: phi reads the replicate-padded source (0), P the reflect-padded (1).
    w1a = first_w(params["f_w1"], params["p_w1"], n_src=2, top_src=0, bot_src=1)
    b1a = first_b(params["f_b1"], params["p_b1"])
    w2a = second_w(params["f_w2"], params["p_w2"])
    b2a = second_b(params["f_b2"], params["p_b2"])

    # Stage 2: psi and U both read the replicate-padded d (single source).
    w1b = first_w(params["s_w1"], params["u_w1"], n_src=1, top_src=0, bot_src=0)
    b1b = first_b(params["s_b1"], params["u_b1"])
    w2b = second_w(params["s_w2"], params["u_w2"])
    b2b = second_b(params["s_b2"], params["u_b2"])

    # Fold eval-mode BatchNorm1d into one scale/shift, padded channels on sublanes.
    scale = params["bn_g"] * lax.rsqrt(params["bn_v"] + BN_EPS)
    bn_a = jnp.zeros((C8, 1), jnp.float32).at[:C, 0].set(scale)
    bn_b = jnp.zeros((C8, 1), jnp.float32).at[:C, 0].set(params["bn_b"] - params["bn_m"] * scale)

    md = matmul_dtype
    return [w1a.astype(md), b1a, w2a.astype(md), b2a,
            w1b.astype(md), b1b, w2b.astype(md), b2b, bn_a, bn_b]


def _pick_batch_block(B, Tseg, lane_target):
    # Fold as many batch elements as possible into the lane axis (amortize the
    # per-grid-step overhead, widen matmul N, unmasked stores), subject to a
    # lane budget.  NOTE(v7x): if tuning by hand, prefer a BB that leaves an
    # even number of grid steps so both TensorCores get equal work.
    best = 1
    for d in range(1, B + 1):
        if B % d == 0 and d * Tseg <= lane_target:
            best = d
    return best


# ---------------------------------------------------------------------------
# Wrapper
# ---------------------------------------------------------------------------
def level_wasn_forward(x, params, regu_details=0.1, regu_approx=0.1,
                       matmul_dtype=jnp.float32, batch_block=None, lane_target=1024):
    B, T, C = x.shape
    if T % 2 != 0:
        raise ValueError("sequence length T must be even")
    Th = T // 2
    if Th < PAD + 1:
        raise ValueError(f"T//2 must be >= {PAD + 1} for reflection padding (got {Th})")
    C8 = _ceil8(C)
    Tseg = Th + 2 * PAD

    BB = batch_block if batch_block is not None else _pick_batch_block(B, Tseg, lane_target)
    if B % BB != 0:
        raise ValueError("batch_block must divide the batch size")
    nb = B // BB
    Lw = BB * Tseg

    # Split even/odd + the module's permute(0,2,1) + channel pad + placement at
    # lane offset PAD inside per-batch segments, batch-folded on the lane axis.
    # Pure layout plumbing (no compute hoisted into the wrapper).
    xt = jnp.transpose(x.reshape(B, Th, 2, C), (0, 2, 3, 1))            # (B,2,C,Th)
    xw = jnp.zeros((B, 2, C8, Tseg), x.dtype).at[:, :, :C, PAD:PAD + Th].set(xt)
    xw = xw.reshape(nb, BB, 2, C8, Tseg).transpose(0, 2, 3, 1, 4).reshape(nb, 2, C8, Lw)

    segcol = jnp.broadcast_to(
        jnp.tile(jnp.arange(Tseg, dtype=jnp.int32), BB)[None, :], (C8, Lw))

    fused = _fuse_params(params, C, matmul_dtype)

    def full_spec(shape):
        nd = len(shape)
        return pl.BlockSpec(shape, lambda i, _nd=nd: (0,) * _nd)

    in_specs = ([pl.BlockSpec((None, 2, C8, Lw), lambda i: (i, 0, 0, 0)),
                 full_spec((C8, Lw))]
                + [full_spec(w.shape) for w in fused])
    out_specs = [pl.BlockSpec((None, C8, Lw), lambda i: (i, 0, 0)),
                 pl.BlockSpec((None, C8, Lw), lambda i: (i, 0, 0))]
    out_shape = (jax.ShapeDtypeStruct((nb, C8, Lw), jnp.float32),
                 jax.ShapeDtypeStruct((nb, C8, Lw), jnp.float32))

    # Rough per-step VMEM estimate (slabs + intermediates + double-buffered IO).
    vmem_est = 4 * Lw * 512 * 2
    vmem_limit = int(min(48 * 2**20, max(16 * 2**20, vmem_est)))

    kernel = functools.partial(level_wasn_kernel, Th=Th)
    out_wide, det_wide = pl.pallas_call(
        kernel,
        out_shape=out_shape,
        grid_spec=pltpu.PrefetchScalarGridSpec(
            num_scalar_prefetch=0, grid=(nb,),
            in_specs=in_specs, out_specs=out_specs),
        compiler_params=pltpu.CompilerParams(
            dimension_semantics=("parallel",),     # batch-block axis, no cross-step state
            vmem_limit_bytes=vmem_limit),
    )(xw, segcol, *fused)

    # Unpack: drop padded channel rows and the per-segment pad/garbage columns.
    ow = out_wide.reshape(nb, C8, BB, Tseg)[:, :C, :, :Th]
    out = jnp.transpose(ow, (0, 2, 3, 1)).reshape(B, Th, C)             # (B, T//2, C)
    dw = det_wide.reshape(nb, C8, BB, Tseg)[:, :C, :, :Th]
    details = jnp.transpose(dw, (0, 2, 1, 3)).reshape(B, C, Th)         # (B, C, T//2)

    # r = regu_details * H.abs().mean() + regu_approx * dist(L.mean(), x.mean());
    # x is rebound to L in the PyTorch forward, so the second term is exactly 0.
    r = regu_details * jnp.mean(jnp.abs(details)) + regu_approx * jnp.float32(0.0)
    return out, r, details


# ---------------------------------------------------------------------------
# Deterministic parameter init (raw PyTorch Conv1d/BatchNorm1d layouts)
# ---------------------------------------------------------------------------
def init_params(key, C, k=K_SIZE, hidden=HIDDEN):
    Ch = C * hidden
    names_shapes = [
        ("p_w1", (Ch, C, k)), ("p_b1", (Ch,)),
        ("p_w2", (C, Ch, K2)), ("p_b2", (C,)),
        ("u_w1", (Ch, C, k)), ("u_b1", (Ch,)),
        ("u_w2", (C, Ch, K2)), ("u_b2", (C,)),
        ("f_w1", (C, C, k)), ("f_b1", (C,)),
        ("f_w2", (C, C, K2)), ("f_b2", (C,)),
        ("s_w1", (C, C, k)), ("s_b1", (C,)),
        ("s_w2", (C, C, K2)), ("s_b2", (C,)),
    ]
    keys = jax.random.split(key, len(names_shapes))
    params = {name: 0.1 * jax.random.normal(kk, shape, dtype=jnp.float32)
              for (name, shape), kk in zip(names_shapes, keys)}
    params["bn_g"] = jnp.ones((C,), jnp.float32)
    params["bn_b"] = jnp.zeros((C,), jnp.float32)
    params["bn_m"] = jnp.zeros((C,), jnp.float32)
    params["bn_v"] = jnp.ones((C,), jnp.float32)
    return params


# ---------------------------------------------------------------------------
# Pure-JAX (XLA) reference of the PyTorch module in eval mode
# ---------------------------------------------------------------------------
def level_wasn_reference(x, params, regu_details=0.1, regu_approx=0.1):
    xe = jnp.transpose(x[:, 0::2, :], (0, 2, 1))   # (B, C, Th)
    xo = jnp.transpose(x[:, 1::2, :], (0, 2, 1))

    def conv1d(v, w, b):                           # valid conv, NCL layout
        K = w.shape[-1]
        L = v.shape[-1]
        out = sum(jnp.einsum('bcl,oc->bol', v[:, :, k:L - K + 1 + k], w[:, :, k])
                  for k in range(K))
        return out + b[None, :, None]

    def pad_repl(v):
        return jnp.concatenate([jnp.repeat(v[:, :, :1], PAD, axis=2), v,
                                jnp.repeat(v[:, :, -1:], PAD, axis=2)], axis=2)

    def pad_refl(v):
        left = v[:, :, 1:PAD + 1][:, :, ::-1]
        right = v[:, :, -PAD - 1:-1][:, :, ::-1]
        return jnp.concatenate([left, v, right], axis=2)

    relu = lambda t: jnp.maximum(t, 0.0)
    P = lambda v: jnp.tanh(conv1d(relu(conv1d(pad_refl(v), params["p_w1"], params["p_b1"])),
                                  params["p_w2"], params["p_b2"]))
    U = lambda v: jnp.tanh(conv1d(relu(conv1d(pad_repl(v), params["u_w1"], params["u_b1"])),
                                  params["u_w2"], params["u_b2"]))
    phi = lambda v: jnp.tanh(conv1d(conv1d(pad_repl(v), params["f_w1"], params["f_b1"]),
                                    params["f_w2"], params["f_b2"]))
    psi = lambda v: jnp.tanh(conv1d(conv1d(pad_repl(v), params["s_w1"], params["s_b1"]),
                                    params["s_w2"], params["s_b2"]))

    d = xo * jnp.exp(phi(xe)) - P(xe)
    c = xe * jnp.exp(psi(d)) + U(d)

    g = params["bn_g"][None, :, None]
    bb = params["bn_b"][None, :, None]
    m = params["bn_m"][None, :, None]
    v_ = params["bn_v"][None, :, None]
    y = relu((c - m) / jnp.sqrt(v_ + BN_EPS) * g + bb)
    out = jnp.transpose(y, (0, 2, 1))              # (B, Th, C)
    r = regu_details * jnp.mean(jnp.abs(d)) + regu_approx * 0.0
    return out, r, d                               # d: (B, C, Th)


if __name__ == "__main__":
    key = jax.random.PRNGKey(0)
    k_x, k_p, k_x2 = jax.random.split(key, 3)
    B, T, C = 2, 16, 4     # (batch, seq_len, in_planes); seq_len even, T//2 >= pad+1
    x = jax.random.normal(k_x, (B, T, C), dtype=jnp.float32)
    params = init_params(k_p, C)

    ref_out, ref_r, ref_det = level_wasn_reference(x, params)

    # Default (f32 matmul operands): check against the XLA reference.
    fwd = jax.jit(level_wasn_forward)
    out, r, det = fwd(x, params)
    jax.block_until_ready((out, r, det))
    assert out.shape == (B, T // 2, C) and det.shape == (B, C, T // 2) and r.shape == ()
    assert jnp.allclose(out, ref_out, atol=2e-2, rtol=2e-2)
    assert jnp.allclose(det, ref_det, atol=2e-2, rtol=2e-2)
    assert jnp.allclose(r, ref_r, atol=2e-2, rtol=2e-2)

    # Multi-step grid path (nb = 2 batch blocks of BB = 2).
    B2, T2 = 4, 24
    x2 = jax.random.normal(k_x2, (B2, T2, C), dtype=jnp.float32)
    ref2_out, ref2_r, ref2_det = level_wasn_reference(x2, params)
    fwd2 = jax.jit(lambda a, p: level_wasn_forward(a, p, batch_block=2))
    out2, r2, det2 = fwd2(x2, params)
    jax.block_until_ready((out2, r2, det2))
    assert out2.shape == (B2, T2 // 2, C) and det2.shape == (B2, C, T2 // 2)
    assert jnp.allclose(out2, ref2_out, atol=2e-2, rtol=2e-2)
    assert jnp.allclose(det2, ref2_det, atol=2e-2, rtol=2e-2)
    assert jnp.allclose(r2, ref2_r, atol=2e-2, rtol=2e-2)

    # bf16-matmul variant (preferred on v5e where f32 MXU passes are costly):
    # loose sanity only — bf16 error is amplified through the exp() paths.
    fwd_bf16 = jax.jit(lambda a, p: level_wasn_forward(a, p, matmul_dtype=jnp.bfloat16))
    ob, rb, db = fwd_bf16(x, params)
    jax.block_until_ready((ob, rb, db))
    assert ob.shape == (B, T // 2, C) and db.shape == (B, C, T // 2) and rb.shape == ()
    assert bool(jnp.all(jnp.isfinite(ob))) and bool(jnp.all(jnp.isfinite(db)))
    assert float(jnp.max(jnp.abs(ob - ref_out))) < 0.15
    assert float(jnp.max(jnp.abs(db - ref_det))) < 0.15

    print("KERNEL_OK")
</pallas_src>

<mosaic_0001>
module attributes {stable_mosaic.version = 11 : i64} {
  func.func @level_wasn_kernel(%arg0: i32, %arg1: memref<1x2x8x24xf32, #tpu.memory_space<vmem>>, %arg2: memref<8x24xi32, #tpu.memory_space<vmem>>, %arg3: memref<24x64xf32, #tpu.memory_space<vmem>>, %arg4: memref<24x1xf32, #tpu.memory_space<vmem>>, %arg5: memref<16x48xf32, #tpu.memory_space<vmem>>, %arg6: memref<16x1xf32, #tpu.memory_space<vmem>>, %arg7: memref<24x32xf32, #tpu.memory_space<vmem>>, %arg8: memref<24x1xf32, #tpu.memory_space<vmem>>, %arg9: memref<16x48xf32, #tpu.memory_space<vmem>>, %arg10: memref<16x1xf32, #tpu.memory_space<vmem>>, %arg11: memref<8x1xf32, #tpu.memory_space<vmem>>, %arg12: memref<8x1xf32, #tpu.memory_space<vmem>>, %arg13: memref<1x8x24xf32, #tpu.memory_space<vmem>>, %arg14: memref<1x8x24xf32, #tpu.memory_space<vmem>>) attributes {dimension_semantics = [#tpu.dimension_semantics<parallel>], iteration_bounds = array<i64: 1>, scalar_prefetch = 0 : i64, scratch_operands = 0 : i64, tpu.core_type = #tpu.core_type<tc>, window_params = [{transform_indices = @transform_0, window_bounds = array<i64: 1, 2, 8, 24>}, {pipeline_mode = #tpu.pipeline_mode<synchronous>, transform_indices = @transform_1, window_bounds = array<i64: 8, 24>}, {pipeline_mode = #tpu.pipeline_mode<synchronous>, transform_indices = @transform_2, window_bounds = array<i64: 24, 64>}, {pipeline_mode = #tpu.pipeline_mode<synchronous>, transform_indices = @transform_3, window_bounds = array<i64: 24, 1>}, {pipeline_mode = #tpu.pipeline_mode<synchronous>, transform_indices = @transform_4, window_bounds = array<i64: 16, 48>}, {pipeline_mode = #tpu.pipeline_mode<synchronous>, transform_indices = @transform_5, window_bounds = array<i64: 16, 1>}, {pipeline_mode = #tpu.pipeline_mode<synchronous>, transform_indices = @transform_6, window_bounds = array<i64: 24, 32>}, {pipeline_mode = #tpu.pipeline_mode<synchronous>, transform_indices = @transform_7, window_bounds = array<i64: 24, 1>}, {pipeline_mode = #tpu.pipeline_mode<synchronous>, transform_indices = @transform_8, window_bounds = array<i64: 16, 48>}, {pipeline_mode = #tpu.pipeline_mode<synchronous>, transform_indices = @transform_9, window_bounds = array<i64: 16, 1>}, {pipeline_mode = #tpu.pipeline_mode<synchronous>, transform_indices = @transform_10, window_bounds = array<i64: 8, 1>}, {pipeline_mode = #tpu.pipeline_mode<synchronous>, transform_indices = @transform_11, window_bounds = array<i64: 8, 1>}, {transform_indices = @transform_12, window_bounds = array<i64: 1, 8, 24>}, {transform_indices = @transform_13, window_bounds = array<i64: 1, 8, 24>}]} {
    %c0 = arith.constant 0 : index
    %c0_0 = arith.constant 0 : index
    %c0_1 = arith.constant 0 : index
    %c0_2 = arith.constant 0 : index
    %0 = vector.load %arg1[%c0, %c0_0, %c0_1, %c0_2] : memref<1x2x8x24xf32, #tpu.memory_space<vmem>>, vector<1x1x8x24xf32>
    %1 = vector.shape_cast %0 : vector<1x1x8x24xf32> to vector<8x24xf32>
    %c0_3 = arith.constant 0 : index
    %c1 = arith.constant 1 : index
    %c0_4 = arith.constant 0 : index
    %c0_5 = arith.constant 0 : index
    %2 = vector.load %arg1[%c0_3, %c1, %c0_4, %c0_5] : memref<1x2x8x24xf32, #tpu.memory_space<vmem>>, vector<1x1x8x24xf32>
    %3 = vector.shape_cast %2 : vector<1x1x8x24xf32> to vector<8x24xf32>
    %c0_6 = arith.constant 0 : index
    %c0_7 = arith.constant 0 : index
    %4 = vector.load %arg2[%c0_6, %c0_7] : memref<8x24xi32, #tpu.memory_space<vmem>>, vector<8x24xi32>
    %c0_i32 = arith.constant 0 : i32
    %5 = vector.broadcast %c0_i32 : i32 to vector<8x24xi32>
    %6 = arith.cmpi eq, %4, %5 : vector<8x24xi32>
    %c1_i32 = arith.constant 1 : i32
    %7 = vector.broadcast %c1_i32 : i32 to vector<8x24xi32>
    %8 = arith.cmpi eq, %4, %7 : vector<8x24xi32>
    %c10_i32 = arith.constant 10 : i32
    %9 = vector.broadcast %c10_i32 : i32 to vector<8x24xi32>
    %10 = arith.cmpi eq, %4, %9 : vector<8x24xi32>
    %c11_i32 = arith.constant 11 : i32
    %11 = vector.broadcast %c11_i32 : i32 to vector<8x24xi32>
    %12 = arith.cmpi eq, %4, %11 : vector<8x24xi32>
    %13 = tpu.iota {dimensions = array<i32: 0>} : vector<24x24xi32>
    %c22_i32 = arith.constant 22 : i32
    %14 = tpu.dynamic_rotate %1 by %c22_i32 dim 1 : vector<8x24xf32>, i32 -> vector<8x24xf32>
    %15 = arith.select %6, %14, %1 : vector<8x24xi1>, vector<8x24xf32>
    %c1_i32_8 = arith.constant 1 : i32
    %16 = tpu.dynamic_rotate %1 by %c1_i32_8 dim 1 : vector<8x24xf32>, i32 -> vector<8x24xf32>
    %17 = arith.select %10, %16, %15 : vector<8x24xi1>, vector<8x24xf32>
    %c20_i32 = arith.constant 20 : i32
    %18 = tpu.dynamic_rotate %1 by %c20_i32 dim 1 : vector<8x24xf32>, i32 -> vector<8x24xf32>
    %19 = arith.select %6, %18, %1 : vector<8x24xi1>, vector<8x24xf32>
    %c2_i32 = arith.constant 2 : i32
    %20 = tpu.dynamic_rotate %1 by %c2_i32 dim 1 : vector<8x24xf32>, i32 -> vector<8x24xf32>
    %21 = arith.select %10, %20, %19 : vector<8x24xi1>, vector<8x24xf32>
    %c23_i32 = arith.constant 23 : i32
    %22 = tpu.dynamic_rotate %1 by %c23_i32 dim 1 : vector<8x24xf32>, i32 -> vector<8x24xf32>
    %23 = arith.select %8, %22, %17 : vector<8x24xi1>, vector<8x24xf32>
    %24 = arith.select %12, %20, %23 : vector<8x24xi1>, vector<8x24xf32>
    %25 = arith.select %8, %14, %21 : vector<8x24xi1>, vector<8x24xf32>
    %c4_i32 = arith.constant 4 : i32
    %26 = tpu.dynamic_rotate %1 by %c4_i32 dim 1 : vector<8x24xf32>, i32 -> vector<8x24xf32>
    %27 = arith.select %12, %26, %25 : vector<8x24xi1>, vector<8x24xf32>
    %c23_i32_9 = arith.constant 23 : i32
    %28 = tpu.dynamic_rotate %24 by %c23_i32_9 dim 1 : vector<8x24xf32>, i32 -> vector<8x24xf32>
    %c22_i32_10 = arith.constant 22 : i32
    %29 = tpu.dynamic_rotate %24 by %c22_i32_10 dim 1 : vector<8x24xf32>, i32 -> vector<8x24xf32>
    %c21_i32 = arith.constant 21 : i32
    %30 = tpu.dynamic_rotate %24 by %c21_i32 dim 1 : vector<8x24xf32>, i32 -> vector<8x24xf32>
    %c23_i32_11 = arith.constant 23 : i32
    %31 = tpu.dynamic_rotate %27 by %c23_i32_11 dim 1 : vector<8x24xf32>, i32 -> vector<8x24xf32>
    %c22_i32_12 = arith.constant 22 : i32
    %32 = tpu.dynamic_rotate %27 by %c22_i32_12 dim 1 : vector<8x24xf32>, i32 -> vector<8x24xf32>
    %c21_i32_13 = arith.constant 21 : i32
    %33 = tpu.dynamic_rotate %27 by %c21_i32_13 dim 1 : vector<8x24xf32>, i32 -> vector<8x24xf32>
    %34 = tpu.concatenate %24, %28, %29, %30, %27, %31, %32, %33 in 0 : vector<8x24xf32>, vector<8x24xf32>, vector<8x24xf32>, vector<8x24xf32>, vector<8x24xf32>, vector<8x24xf32>, vector<8x24xf32>, vector<8x24xf32> -> vector<64x24xf32>
    %c0_14 = arith.constant 0 : index
    %c0_15 = arith.constant 0 : index
    %35 = vector.load %arg3[%c0_14, %c0_15] : memref<24x64xf32, #tpu.memory_space<vmem>>, vector<24x64xf32>
    %cst = arith.constant dense<0.000000e+00> : vector<24x24xf32>
    %36 = tpu.matmul %35, %34, %cst {dimension_numbers = #tpu.dot_dimension_numbers<[1], [0], [0], [1], [0, 0, 1, 1], [], []>} : vector<24x64xf32>, vector<64x24xf32>, vector<24x24xf32> -> vector<24x24xf32>
    %c0_16 = arith.constant 0 : index
    %c0_17 = arith.constant 0 : index
    %37 = vector.load %arg4[%c0_16, %c0_17] : memref<24x1xf32, #tpu.memory_space<vmem>>, vector<24x1xf32>
    %38 = vector.broadcast %37 : vector<24x1xf32> to vector<24x24xf32>
    %39 = arith.addf %36, %38 : vector<24x24xf32>
    %c8_i32 = arith.constant 8 : i32
    %40 = vector.broadcast %c8_i32 : i32 to vector<24x24xi32>
    %41 = arith.cmpi slt, %13, %40 : vector<24x24xi32>
    %cst_18 = arith.constant 0.000000e+00 : f32
    %42 = vector.broadcast %cst_18 : f32 to vector<24x24xf32>
    %43 = arith.maximumf %39, %42 : vector<24x24xf32>
    %44 = arith.select %41, %39, %43 : vector<24x24xi1>, vector<24x24xf32>
    %c23_i32_19 = arith.constant 23 : i32
    %45 = tpu.dynamic_rotate %44 by %c23_i32_19 dim 1 : vector<24x24xf32>, i32 -> vector<24x24xf32>
    %46 = tpu.concatenate %44, %45 in 0 : vector<24x24xf32>, vector<24x24xf32> -> vector<48x24xf32>
    %c0_20 = arith.constant 0 : index
    %c0_21 = arith.constant 0 : index
    %47 = vector.load %arg5[%c0_20, %c0_21] : memref<16x48xf32, #tpu.memory_space<vmem>>, vector<16x48xf32>
    %cst_22 = arith.constant dense<0.000000e+00> : vector<16x24xf32>
    %48 = tpu.matmul %47, %46, %cst_22 {dimension_numbers = #tpu.dot_dimension_numbers<[1], [0], [0], [1], [0, 0, 1, 1], [], []>} : vector<16x48xf32>, vector<48x24xf32>, vector<16x24xf32> -> vector<16x24xf32>
    %c0_23 = arith.constant 0 : index
    %c0_24 = arith.constant 0 : index
    %49 = vector.load %arg6[%c0_23, %c0_24] : memref<16x1xf32, #tpu.memory_space<vmem>>, vector<16x1xf32>
    %50 = vector.broadcast %49 : vector<16x1xf32> to vector<16x24xf32>
    %51 = arith.addf %48, %50 : vector<16x24xf32>
    %52 = math.tanh %51 : vector<16x24xf32>
    %c22_i32_25 = arith.constant 22 : i32
    %53 = tpu.dynamic_rotate %3 by %c22_i32_25 dim 1 : vector<8x24xf32>, i32 -> vector<8x24xf32>
    %54 = vector.extract_strided_slice %52 {offsets = [0, 0], sizes = [8, 24], strides = [1, 1]} : vector<16x24xf32> to vector<8x24xf32>
    %55 = math.exp %54 : vector<8x24xf32>
    %56 = arith.mulf %53, %55 : vector<8x24xf32>
    %57 = vector.extract_strided_slice %52 {offsets = [8, 0], sizes = [8, 24], strides = [1, 1]} : vector<16x24xf32> to vector<8x24xf32>
    %58 = arith.subf %56, %57 : vector<8x24xf32>
    %c2_i32_26 = arith.constant 2 : i32
    %59 = tpu.dynamic_rotate %58 by %c2_i32_26 dim 1 : vector<8x24xf32>, i32 -> vector<8x24xf32>
    %60 = arith.select %6, %58, %59 : vector<8x24xi1>, vector<8x24xf32>
    %c3_i32 = arith.constant 3 : i32
    %61 = tpu.dynamic_rotate %58 by %c3_i32 dim 1 : vector<8x24xf32>, i32 -> vector<8x24xf32>
    %62 = arith.select %10, %61, %60 : vector<8x24xi1>, vector<8x24xf32>
    %c1_i32_27 = arith.constant 1 : i32
    %63 = tpu.dynamic_rotate %58 by %c1_i32_27 dim 1 : vector<8x24xf32>, i32 -> vector<8x24xf32>
    %64 = arith.select %8, %63, %62 : vector<8x24xi1>, vector<8x24xf32>
    %c4_i32_28 = arith.constant 4 : i32
    %65 = tpu.dynamic_rotate %58 by %c4_i32_28 dim 1 : vector<8x24xf32>, i32 -> vector<8x24xf32>
    %66 = arith.select %12, %65, %64 : vector<8x24xi1>, vector<8x24xf32>
    %c23_i32_29 = arith.constant 23 : i32
    %67 = tpu.dynamic_rotate %66 by %c23_i32_29 dim 1 : vector<8x24xf32>, i32 -> vector<8x24xf32>
    %c22_i32_30 = arith.constant 22 : i32
    %68 = tpu.dynamic_rotate %66 by %c22_i32_30 dim 1 : vector<8x24xf32>, i32 -> vector<8x24xf32>
    %c21_i32_31 = arith.constant 21 : i32
    %69 = tpu.dynamic_rotate %66 by %c21_i32_31 dim 1 : vector<8x24xf32>, i32 -> vector<8x24xf32>
    %70 = tpu.concatenate %66, %67, %68, %69 in 0 : vector<8x24xf32>, vector<8x24xf32>, vector<8x24xf32>, vector<8x24xf32> -> vector<32x24xf32>
    %c0_32 = arith.constant 0 : index
    %c0_33 = arith.constant 0 : index
    %71 = vector.load %arg7[%c0_32, %c0_33] : memref<24x32xf32, #tpu.memory_space<vmem>>, vector<24x32xf32>
    %cst_34 = arith.constant dense<0.000000e+00> : vector<24x24xf32>
    %72 = tpu.matmul %71, %70, %cst_34 {dimension_numbers = #tpu.dot_dimension_numbers<[1], [0], [0], [1], [0, 0, 1, 1], [], []>} : vector<24x32xf32>, vector<32x24xf32>, vector<24x24xf32> -> vector<24x24xf32>
    %c0_35 = arith.constant 0 : index
    %c0_36 = arith.constant 0 : index
    %73 = vector.load %arg8[%c0_35, %c0_36] : memref<24x1xf32, #tpu.memory_space<vmem>>, vector<24x1xf32>
    %74 = vector.broadcast %73 : vector<24x1xf32> to vector<24x24xf32>
    %75 = arith.addf %72, %74 : vector<24x24xf32>
    %c8_i32_37 = arith.constant 8 : i32
    %76 = vector.broadcast %c8_i32_37 : i32 to vector<24x24xi32>
    %77 = arith.cmpi slt, %13, %76 : vector<24x24xi32>
    %cst_38 = arith.constant 0.000000e+00 : f32
    %78 = vector.broadcast %cst_38 : f32 to vector<24x24xf32>
    %79 = arith.maximumf %75, %78 : vector<24x24xf32>
    %80 = arith.select %77, %75, %79 : vector<24x24xi1>, vector<24x24xf32>
    %c23_i32_39 = arith.constant 23 : i32
    %81 = tpu.dynamic_rotate %80 by %c23_i32_39 dim 1 : vector<24x24xf32>, i32 -> vector<24x24xf32>
    %82 = tpu.concatenate %80, %81 in 0 : vector<24x24xf32>, vector<24x24xf32> -> vector<48x24xf32>
    %c0_40 = arith.constant 0 : index
    %c0_41 = arith.constant 0 : index
    %83 = vector.load %arg9[%c0_40, %c0_41] : memref<16x48xf32, #tpu.memory_space<vmem>>, vector<16x48xf32>
    %cst_42 = arith.constant dense<0.000000e+00> : vector<16x24xf32>
    %84 = tpu.matmul %83, %82, %cst_42 {dimension_numbers = #tpu.dot_dimension_numbers<[1], [0], [0], [1], [0, 0, 1, 1], [], []>} : vector<16x48xf32>, vector<48x24xf32>, vector<16x24xf32> -> vector<16x24xf32>
    %c0_43 = arith.constant 0 : index
    %c0_44 = arith.constant 0 : index
    %85 = vector.load %arg10[%c0_43, %c0_44] : memref<16x1xf32, #tpu.memory_space<vmem>>, vector<16x1xf32>
    %86 = vector.broadcast %85 : vector<16x1xf32> to vector<16x24xf32>
    %87 = arith.addf %84, %86 : vector<16x24xf32>
    %88 = math.tanh %87 : vector<16x24xf32>
    %89 = vector.extract_strided_slice %88 {offsets = [0, 0], sizes = [8, 24], strides = [1, 1]} : vector<16x24xf32> to vector<8x24xf32>
    %90 = math.exp %89 : vector<8x24xf32>
    %91 = arith.mulf %14, %90 : vector<8x24xf32>
    %92 = vector.extract_strided_slice %88 {offsets = [8, 0], sizes = [8, 24], strides = [1, 1]} : vector<16x24xf32> to vector<8x24xf32>
    %93 = arith.addf %91, %92 : vector<8x24xf32>
    %c0_45 = arith.constant 0 : index
    %c0_46 = arith.constant 0 : index
    %94 = vector.load %arg11[%c0_45, %c0_46] : memref<8x1xf32, #tpu.memory_space<vmem>>, vector<8x1xf32>
    %95 = vector.broadcast %94 : vector<8x1xf32> to vector<8x24xf32>
    %96 = arith.mulf %93, %95 : vector<8x24xf32>
    %c0_47 = arith.constant 0 : index
    %c0_48 = arith.constant 0 : index
    %97 = vector.load %arg12[%c0_47, %c0_48] : memref<8x1xf32, #tpu.memory_space<vmem>>, vector<8x1xf32>
    %98 = vector.broadcast %97 : vector<8x1xf32> to vector<8x24xf32>
    %99 = arith.addf %96, %98 : vector<8x24xf32>
    %cst_49 = arith.constant 0.000000e+00 : f32
    %100 = vector.broadcast %cst_49 : f32 to vector<8x24xf32>
    %101 = arith.maximumf %99, %100 : vector<8x24xf32>
    %c0_50 = arith.constant 0 : index
    %c0_51 = arith.constant 0 : index
    %c0_52 = arith.constant 0 : index
    %102 = vector.load %arg13[%c0_50, %c0_51, %c0_52] : memref<1x8x24xf32, #tpu.memory_space<vmem>>, vector<1x8x24xf32>
    %103 = vector.shape_cast %102 : vector<1x8x24xf32> to vector<8x24xf32>
    %104 = vector.shape_cast %101 : vector<8x24xf32> to vector<1x8x24xf32>
    tpu.vector_store %arg13[%c0_50, %c0_51, %c0_52], %104 {strides = array<i32>} : memref<1x8x24xf32, #tpu.memory_space<vmem>>, vector<1x8x24xf32>,
    %c0_53 = arith.constant 0 : index
    %c0_54 = arith.constant 0 : index
    %c0_55 = arith.constant 0 : index
    %105 = vector.load %arg14[%c0_53, %c0_54, %c0_55] : memref<1x8x24xf32, #tpu.memory_space<vmem>>, vector<1x8x24xf32>
    %106 = vector.shape_cast %105 : vector<1x8x24xf32> to vector<8x24xf32>
    %107 = vector.shape_cast %58 : vector<8x24xf32> to vector<1x8x24xf32>
    tpu.vector_store %arg14[%c0_53, %c0_54, %c0_55], %107 {strides = array<i32>} : memref<1x8x24xf32, #tpu.memory_space<vmem>>, vector<1x8x24xf32>,
    return
  }
  func.func @transform_0(%arg0: i32) -> (i32, i32, i32, i32) {
    %c0_i32 = arith.constant 0 : i32
    %c0_i32_0 = arith.constant 0 : i32
    %c0_i32_1 = arith.constant 0 : i32
    %c0_i32_2 = arith.constant 0 : i32
    return %arg0, %c0_i32, %c0_i32_0, %c0_i32_1 : i32, i32, i32, i32
  }
  func.func @transform_1(%arg0: i32) -> (i32, i32) {
    %c0_i32 = arith.constant 0 : i32
    %c0_i32_0 = arith.constant 0 : i32
    %c0_i32_1 = arith.constant 0 : i32
    return %c0_i32, %c0_i32_0 : i32, i32
  }
  func.func @transform_2(%arg0: i32) -> (i32, i32) {
    %c0_i32 = arith.constant 0 : i32
    %c0_i32_0 = arith.constant 0 : i32
    %c0_i32_1 = arith.constant 0 : i32
    return %c0_i32, %c0_i32_0 : i32, i32
  }
  func.func @transform_3(%arg0: i32) -> (i32, i32) {
    %c0_i32 = arith.constant 0 : i32
    %c0_i32_0 = arith.constant 0 : i32
    %c0_i32_1 = arith.constant 0 : i32
    return %c0_i32, %c0_i32_0 : i32, i32
  }
  func.func @transform_4(%arg0: i32) -> (i32, i32) {
    %c0_i32 = arith.constant 0 : i32
    %c0_i32_0 = arith.constant 0 : i32
    %c0_i32_1 = arith.constant 0 : i32
    return %c0_i32, %c0_i32_0 : i32, i32
  }
  func.func @transform_5(%arg0: i32) -> (i32, i32) {
    %c0_i32 = arith.constant 0 : i32
    %c0_i32_0 = arith.constant 0 : i32
    %c0_i32_1 = arith.constant 0 : i32
    return %c0_i32, %c0_i32_0 : i32, i32
  }
  func.func @transform_6(%arg0: i32) -> (i32, i32) {
    %c0_i32 = arith.constant 0 : i32
    %c0_i32_0 = arith.constant 0 : i32
    %c0_i32_1 = arith.constant 0 : i32
    return %c0_i32, %c0_i32_0 : i32, i32
  }
  func.func @transform_7(%arg0: i32) -> (i32, i32) {
    %c0_i32 = arith.constant 0 : i32
    %c0_i32_0 = arith.constant 0 : i32
    %c0_i32_1 = arith.constant 0 : i32
    return %c0_i32, %c0_i32_0 : i32, i32
  }
  func.func @transform_8(%arg0: i32) -> (i32, i32) {
    %c0_i32 = arith.constant 0 : i32
    %c0_i32_0 = arith.constant 0 : i32
    %c0_i32_1 = arith.constant 0 : i32
    return %c0_i32, %c0_i32_0 : i32, i32
  }
  func.func @transform_9(%arg0: i32) -> (i32, i32) {
    %c0_i32 = arith.constant 0 : i32
    %c0_i32_0 = arith.constant 0 : i32
    %c0_i32_1 = arith.constant 0 : i32
    return %c0_i32, %c0_i32_0 : i32, i32
  }
  func.func @transform_10(%arg0: i32) -> (i32, i32) {
    %c0_i32 = arith.constant 0 : i32
    %c0_i32_0 = arith.constant 0 : i32
    %c0_i32_1 = arith.constant 0 : i32
    return %c0_i32, %c0_i32_0 : i32, i32
  }
  func.func @transform_11(%arg0: i32) -> (i32, i32) {
    %c0_i32 = arith.constant 0 : i32
    %c0_i32_0 = arith.constant 0 : i32
    %c0_i32_1 = arith.constant 0 : i32
    return %c0_i32, %c0_i32_0 : i32, i32
  }
  func.func @transform_12(%arg0: i32) -> (i32, i32, i32) {
    %c0_i32 = arith.constant 0 : i32
    %c0_i32_0 = arith.constant 0 : i32
    %c0_i32_1 = arith.constant 0 : i32
    return %arg0, %c0_i32, %c0_i32_0 : i32, i32, i32
  }
  func.func @transform_13(%arg0: i32) -> (i32, i32, i32) {
    %c0_i32 = arith.constant 0 : i32
    %c0_i32_0 = arith.constant 0 : i32
    %c0_i32_1 = arith.constant 0 : i32
    return %arg0, %c0_i32, %c0_i32_0 : i32, i32, i32
  }
}

</mosaic_0001>

<bundles_post_ra>
// kernel: level_wasn_forward.1
= control target key start
LH: loop header
LB: loop body
LE: loop exit
PB: predicated region body
PF: predicated region fallthrough
CT: control target
= control target key end

     0   :  { %s860_s27 = smov 24   ;;  %vm55_vm0 = vcmask 1047744   ;;  %s861_s28 = smov 126   ;;  %v867_v21 = vmov 0.0   ;;  %vm869_vm5 = vmmov 0   ;;  %v870_v29 = vmov 0   ;;  %s1170_s0 = inlined_call_operand.vmem [shape: f32[1,2,8,24], index: 0, kind: input, shape index: {}]   ;;  %s1171_s1 = inlined_call_operand.vmem [shape: s32[8,24], index: 1, kind: input, shape index: {}]   ;;  %s1172_s3 = inlined_call_operand.vmem [shape: f32[24,1], index: 3, kind: input, shape index: {}]   ;;  %s1173_s2 = inlined_call_operand.vmem [shape: f32[24,64], index: 2, kind: input, shape index: {}]   ;;  %s1174_s5 = inlined_call_operand.vmem [shape: f32[16,1], index: 5, kind: input, shape index: {}]   ;;  %s1175_s4 = inlined_call_operand.vmem [shape: f32[16,48], index: 4, kind: input, shape index: {}]   ;;  %s1176_s13 = inlined_call_operand.vmem [shape: f32[1,8,24], index: 13, kind: output, shape index: {1}]   ;;  %s1177_s7 = inlined_call_operand.vmem [shape: f32[24,1], index: 7, kind: input, shape index: {}]   ;;  %s1178_s6 = inlined_call_operand.vmem [shape: f32[24,32], index: 6, kind: input, shape index: {}]   ;;  %s1179_s9 = inlined_call_operand.vmem [shape: f32[16,1], index: 9, kind: input, shape index: {}]   ;;  %s1180_s8 = inlined_call_operand.vmem [shape: f32[16,48], index: 8, kind: input, shape index: {}]   ;;  %s1181_s10 = inlined_call_operand.vmem [shape: f32[8,1], index: 10, kind: input, shape index: {}]   ;;  %s1182_s11 = inlined_call_operand.vmem [shape: f32[8,1], index: 11, kind: input, shape index: {}]   ;;  %s1183_s12 = inlined_call_operand.vmem [shape: f32[1,8,24], index: 12, kind: output, shape index: {0}]  }
   0x1   :  { %v43_v0 = vld [vmem:[%s1170_s0] sm:$0xff]  ;;  %s862_s29 = smov 124   ;;  %s863_s30 = smov 105   ;;  %761 = vmatprep.subr.mxu0 %v867_v21  ;;  %777 = vmatprep.mubr.msk.f32.mxu0 %vm869_vm5, %v867_v21  ;;  %v125_v30 = vld [vmem:[%s1172_s3 + $0x8] sm:$0xff]  ;;  %v126_v31 = vld [vmem:[%s1172_s3 + $0x10] sm:$0xff]  ;;  %vm142_vm6 = vcmask 523264  }
   0x2   :  { %56 = vrot.lane.b32.xlu0 %v43_v0, %s860_s27  ;;  %s864_s14 = smov 106   ;;  %s865_s15 = smov 108   ;;  %v966_v5 = vld [vmem:[%s1171_s1] sm:$0xff]  ;;  %847 = vset.pattern.permute.xlu1 %v870_v29  ;;  %v122_v40 = vld [vmem:[%s1173_s2 + $0x8] sm:$0xff]  ;;  %v123_v41 = vld [vmem:[%s1173_s2 + $0x10] sm:$0xff]  ;;  %vm285_vm7 = vcmask 392192  }
   0x3   :  { %s866_s16 = smov 127   ;;  %vm47_vm1 = vcmp.eq.s32.totalorder %v966_v5, 0  ;;  %vm49_vm2 = vcmp.eq.s32.totalorder %v966_v5, 10  ;;  %vm48_vm3 = vcmp.eq.s32.totalorder %v966_v5, 1  ;;  %vm50_vm4 = vcmp.eq.s32.totalorder %v966_v5, 11  ;;  %s868_s1 = smov 125   ;;  %846 = vset.pattern.permute.xlu0 %v870_v29 }
   0x4   :  { %v124_v32 = vld [vmem:[%s1172_s3] sm:$0xff]  ;;  %vm705_vm8 = vcmask 195584   ;;  %vm451_vm9 = vcmask 261120  }
   0x5   :  { %v121_v39 = vld [vmem:[%s1173_s2] sm:$0xff] }
   0x6   :  { %v433_v5 = vld [vmem:[%s1177_s7] sm:$0xff] }
  0x74   :  { %v57_v1 = vpop.permute.xlu0 %56 }
  0x75   :  { %v58_v2 = vsel %vm55_vm0, %v57_v1, %v43_v0  ;;  %v271_v1 = vld [vmem:[%s1175_s4] sm:$0xff] }
  0x76   :  { %59 = vrot.lane.b32.xlu0 %v58_v2, %s860_s27  ;;  %798 = vmatprep.mubr.msk.f32.mxu1 %vm285_vm7, %v271_v1 }
  0xe8   :  { %v60_v3 = vpop.permute.xlu0 %59 }
  0xe9   :  { %v950_v4 = vsel %vm55_vm0, %v60_v3, %v43_v0 }
  0xea   :  { %63 = vrot.lane.b32.xlu0 %v950_v4, %s861_s28  ;;  %71 = vrot.lane.b32.xlu1 %v950_v4, %s862_s29  ;;  %s872_s29 = smov 107  }
  0xee   :  { %67 = vrot.lane.b32.xlu0 %v950_v4, %s863_s30  ;;  %75 = vrot.lane.b32.xlu1 %v950_v4, %s864_s14 }
  0xf2   :  { %85 = vrot.lane.b32.xlu1 %v950_v4, %s865_s15 }
  0xf6   :  { %79 = vrot.lane.b32.xlu1 %v950_v4, %s866_s16 }
 0x15c   :  { %v72_v6 = vpop.permute.xlu1 %71  ;;  %v64_v7 = vpop.permute.xlu0 %63 }
 0x15d   :  { %v74_v8 = vsel %vm47_vm1, %v72_v6, %v43_v0  ;;  %v66_v15 = vsel %vm47_vm1, %v64_v7, %v43_v0  ;;  %v273_v0 = vld [vmem:[%s1174_s5] sm:$0xff] }
 0x160   :  { %v76_v9 = vpop.permute.xlu1 %75  ;;  %v68_v13 = vpop.permute.xlu0 %67 }
 0x161   :  { %v78_v10 = vsel %vm49_vm2, %v76_v9, %v74_v8  ;;  %v70_v16 = vsel %vm49_vm2, %v68_v13, %v66_v15  ;;  %v716_v8 = vld [vmem:[%s1170_s0 + $0x8] sm:$0xff] }
 0x162   :  { %v84_v11 = vsel %vm48_vm3, %v64_v7, %v78_v10  ;;  %v272_v13 = vld [vmem:[%s1175_s4 + $0x8] sm:$0xff]  ;;  %s871_s4 = smov 2  }
 0x164   :  { %v86_v12 = vpop.permute.xlu1 %85 }
 0x165   :  { %v88_v14 = vsel %vm50_vm4, %v86_v12, %v84_v11 }
 0x166   :  { %95 = vrot.lane.b32.xlu0 %v88_v14, %s860_s27 }
 0x168   :  { %v80_v17 = vpop.permute.xlu1 %79 }
 0x169   :  { %v82_v18 = vsel %vm48_vm3, %v80_v17, %v70_v16 }
 0x16a   :  { %v83_v19 = vsel %vm50_vm4, %v76_v9, %v82_v18  ;;  %v274_v9 = vld [vmem:[%s1174_s5 + $0x8] sm:$0xff] }
 0x16b   :  { %89 = vrot.lane.b32.xlu1 %v83_v19, %s860_s27 }
 0x1d8   :  { %v96_v20 = vpop.permute.xlu0 %95 }
 0x1d9   :  { %v97_v22 = vsel %vm55_vm0, %v96_v20, %v88_v14 }
 0x1da   :  { %98 = vrot.lane.b32.xlu0 %v97_v22, %s860_s27 }
 0x1dd   :  { %v90_v23 = vpop.permute.xlu1 %89 }
 0x1de   :  { %v91_v24 = vsel %vm55_vm0, %v90_v23, %v83_v19 }
 0x1df   :  { %92 = vrot.lane.b32.xlu1 %v91_v24, %s860_s27 }
 0x24c   :  { %v99_v25 = vpop.permute.xlu0 %98 }
 0x24d   :  { %v100_v26 = vsel %vm55_vm0, %v99_v25, %v88_v14 }
 0x24e   :  { %118 = vrot.lane.b32.xlu0 %v100_v26, %s868_s1  ;;  %115 = vrot.lane.b32.xlu1 %v100_v26, %s861_s28 }
 0x251   :  { %v93_v27 = vpop.permute.xlu1 %92 }
 0x252   :  { %112 = vrot.lane.b32.xlu0 %v100_v26, %s866_s16  ;;  %v94_v28 = vsel %vm55_vm0, %v93_v27, %v83_v19 }
 0x253   :  { %108 = vrot.lane.b32.xlu1 %v94_v28, %s868_s1 }
 0x256   :  { %105 = vrot.lane.b32.xlu0 %v94_v28, %s861_s28 }
 0x257   :  { %102 = vrot.lane.b32.xlu1 %v94_v28, %s866_s16 }
 0x25a   :  { %139 = vperm.xlu0 %846, %v126_v31  }
 0x25b   :  { %134 = vperm.xlu1 %847, %v125_v30  }
 0x25f   :  { %129 = vperm.xlu1 %847, %v124_v32  }
 0x2c0   :  { %v119_v33 = vpop.permute.xlu0 %118  ;;  %v116_v34 = vpop.permute.xlu1 %115 }
 0x2c1   :  { %762 = vmatpush3.msra.mxu0 %v119_v33 }
 0x2c2   :  { %763 = vmatprep.subr.mxu0 %v867_v21 }
 0x2c3   :  { %764 = vmatpush3.msra.mxu0 %v116_v34 }
 0x2c4   :  { %v113_v35 = vpop.permute.xlu0 %112  ;;  %765 = vmatprep.subr.mxu0 %v867_v21 }
 0x2c5   :  { %766 = vmatpush3.msra.mxu0 %v113_v35  ;;  %v109_v36 = vpop.permute.xlu1 %108 }
 0x2c6   :  { %767 = vmatprep.subr.mxu0 %v867_v21 }
 0x2c7   :  { %768 = vmatpush3.msra.mxu0 %v88_v14 }
 0x2c8   :  { %769 = vmatprep.subr.mxu0 %v867_v21  ;;  %v106_v37 = vpop.permute.xlu0 %105 }
 0x2c9   :  { %770 = vmatpush3.msra.mxu0 %v109_v36  ;;  %v103_v38 = vpop.permute.xlu1 %102 }
 0x2ca   :  { %771 = vmatprep.subr.mxu0 %v867_v21 }
 0x2cb   :  { %772 = vmatpush3.msra.mxu0 %v106_v37 }
 0x2cc   :  { %773 = vmatprep.subr.mxu0 %v867_v21 }
 0x2cd   :  { %774 = vmatpush3.msra.mxu0 %v103_v38 }
 0x2ce   :  { %775 = vmatprep.subr.mxu0 %v867_v21 }
 0x2cf   :  { %776 = vmatpush3.msra.mxu0 %v83_v19 }
 0x2d0   :  { %778 = vmatmul.mubr.msk.f32.vlgmr.msra.gmra.mxu0 %vm142_vm6, %v121_v39 }
 0x2d1   :  { %780 = vmatprep.mubr.msk.f32.mxu0 %vm869_vm5, %v867_v21 }
 0x2d4   :  { %781 = vmatmul.mubr.msk.f32.gmra.mxu0 %vm142_vm6, %v122_v40 }
 0x2d5   :  { %783 = vmatprep.mubr.msk.f32.mxu0 %vm869_vm5, %v867_v21  ;;  %v140_v48 = vpop.permute.xlu0 %139 }
 0x2d6   :  { %v135_v44 = vpop.permute.xlu1 %134 }
 0x2d8   :  { %784 = vmatmul.mubr.msk.f32.gmra.mxu0 %vm142_vm6, %v123_v41 }
 0x2da   :  { %v130_v54 = vpop.permute.xlu1 %129 }
 0x390   :  { %v218_v42 = vpop.f32.mrf.mxu0 }
 0x391   :  { %v219_v55 = vadd.f32 %v218_v42, %v130_v54 }
 0x392   :  { %v779_v43 = vpop.f32.mrf.mxu0 }
 0x394   :  { %v223_v45 = vpop.f32.mrf.mxu0 }
 0x395   :  { %v224_v46 = vadd.f32 %v223_v45, %v135_v44 }
 0x396   :  { %v782_v47 = vpop.f32.mrf.mxu0 }
 0x397   :  { %v236_v49 = vmax.f32 %v224_v46, 0.0 }
 0x398   :  { %v228_v50 = vpop.f32.mrf.mxu0 }
 0x399   :  { %v229_v51 = vadd.f32 %v228_v50, %v140_v48  ;;  %244 = vrot.lane.b32.xlu1 %v236_v49, %s860_s27  ;;  %v435_v50 = vld [vmem:[%s1177_s7 + $0x10] sm:$0xff] }
 0x39a   :  { %v785_v52 = vpop.f32.mrf.mxu0 }
 0x39b   :  { %v237_v53 = vmax.f32 %v229_v51, 0.0  ;;  %v434_v51 = vld [vmem:[%s1177_s7 + $0x8] sm:$0xff] }
 0x39d   :  { %247 = vrot.lane.b32.xlu0 %v237_v53, %s860_s27 }
 0x3a1   :  { %241 = vrot.lane.b32.xlu0 %v219_v55, %s860_s27 }
 0x40b   :  { %v245_v56 = vpop.permute.xlu1 %244 }
 0x40c   :  { %v246_v57 = vsel %vm55_vm0, %v245_v56, %v236_v49  ;;  %v431_v56 = vld [vmem:[%s1178_s6 + $0x8] sm:$0xff] }
 0x40d   :  { %252 = vrot.lane.b32.xlu0 %v246_v57, %s860_s27  ;;  %v432_v57 = vld [vmem:[%s1178_s6 + $0x10] sm:$0xff] }
 0x40f   :  { %v248_v58 = vpop.permute.xlu0 %247 }
 0x410   :  { %v249_v59 = vsel %vm55_vm0, %v248_v58, %v237_v53 }
 0x411   :  { %254 = vrot.lane.b32.xlu1 %v249_v59, %s860_s27 }
 0x413   :  { %v242_v60 = vpop.permute.xlu0 %241 }
 0x414   :  { %v243_v61 = vsel %vm55_vm0, %v242_v60, %v219_v55 }
 0x415   :  { %250 = vrot.lane.b32.xlu1 %v243_v61, %s860_s27 }
 0x47f   :  { %v253_v62 = vpop.permute.xlu0 %252 }
 0x480   :  { %v257_v63 = vsel %vm55_vm0, %v253_v62, %v236_v49 }
 0x481   :  { %264 = vrot.lane.b32.xlu1 %v257_v63, %s866_s16 }
 0x483   :  { %v255_v2 = vpop.permute.xlu1 %254 }
 0x484   :  { %v258_v3 = vsel %vm55_vm0, %v255_v2, %v237_v53 }
 0x485   :  { %277 = vperm.xlu1 %847, %v273_v0   ;;  %266 = vrot.lane.b32.xlu0 %v258_v3, %s866_s16 }
 0x487   :  { %v251_v6 = vpop.permute.xlu1 %250 }
 0x488   :  { %v256_v7 = vsel %vm55_vm0, %v251_v6, %v219_v55 }
 0x489   :  { %262 = vrot.lane.b32.xlu0 %v256_v7, %s866_s16  ;;  %369 = vrot.lane.b32.xlu1 %v716_v8, %s860_s27 }
 0x48d   :  { %282 = vperm.xlu0 %846, %v274_v9  }
 0x4f3   :  { %v265_v11 = vpop.permute.xlu1 %264 }
 0x4f7   :  { %v267_v10 = vpop.permute.xlu0 %266 }
 0x4f8   :  { %786 = vmatprep.subr.mxu1 %v267_v10 }
 0x4f9   :  { %787 = vmatpush3.msra.mxu1 %v267_v10 }
 0x4fa   :  { %788 = vmatprep.subr.mxu1 %v265_v11 }
 0x4fb   :  { %v263_v12 = vpop.permute.xlu0 %262  ;;  %789 = vmatpush3.msra.mxu1 %v265_v11 }
 0x4fc   :  { %790 = vmatprep.subr.mxu1 %v263_v12 }
 0x4fd   :  { %791 = vmatpush3.msra.mxu1 %v263_v12 }
 0x4fe   :  { %792 = vmatprep.subr.mxu1 %v237_v53 }
 0x4ff   :  { %793 = vmatpush3.msra.mxu1 %v237_v53 }
 0x500   :  { %794 = vmatprep.subr.mxu1 %v236_v49  ;;  %v278_v14 = vpop.permute.xlu1 %277 }
 0x501   :  { %795 = vmatpush3.msra.mxu1 %v236_v49 }
 0x502   :  { %796 = vmatprep.subr.mxu1 %v219_v55 }
 0x503   :  { %797 = vmatpush3.msra.mxu1 %v219_v55  ;;  %v430_v55 = vld [vmem:[%s1178_s6] sm:$0xff] }
 0x504   :  { %799 = vmatmul.mubr.msk.f32.vlgmr.msra.gmra.mxu1 %vm285_vm7, %v272_v13  ;;  %801 = vmatprep.subr.mxu1 %v867_v21  ;;  %v370_v15 = vpop.permute.xlu1 %369 }
 0x505   :  { %809 = vmatprep.mubr.msk.f32.mxu1 %vm869_vm5, %v867_v21  ;;  %v371_v16 = vsel %vm55_vm0, %v370_v15, %v716_v8 }
 0x506   :  { %372 = vrot.lane.b32.xlu0 %v371_v16, %s860_s27 }
 0x508   :  { %v283_v17 = vpop.permute.xlu0 %282 }
 0x578   :  { %v373_v27 = vpop.permute.xlu0 %372 }
 0x579   :  { %v374_v28 = vsel %vm55_vm0, %v373_v27, %v716_v8 }
 0x5c4   :  { %v800_v18 = vpop.f32.mrf.mxu1 }
 0x5c5   :  { %v364_v19 = vadd.f32 %v800_v18, %v283_v17  ;;  %v579_v17 = vld [vmem:[%s1179_s9] sm:$0xff] }
 0x5c6   :  { %v358_v20 = vpop.f32.mrf.mxu1  ;;  %v577_v18 = vld [vmem:[%s1180_s8] sm:$0xff] }
 0x5c7   :  { %848 = vtanh.f32 %v364_v19  ;;  %v359_v22 = vadd.f32 %v358_v20, %v278_v14  ;;  %830 = vmatprep.mubr.msk.f32.mxu0 %vm285_vm7, %v577_v18 }
 0x5c9   :  { %850 = vtanh.f32 %v359_v22  ;;  %v686_v22 = vld [vmem:[%s1181_s10] sm:$0xff] }
 0x5d4   :  { %v849_v23 = vpop.eup %848 }
 0x5d5   :  { %383 = vrot.lane.b32.xlu0 %v849_v23, %s871_s4 }
 0x5d6   :  { %v851_v24 = vpop.eup %850 }
 0x5d7   :  { %v375_v25 = vmul.f32 1.442695, %v851_v24 }
 0x5d9   :  { %852 = vpow2.f32 %v375_v25  ;;  %v580_v25 = vld [vmem:[%s1179_s9 + $0x8] sm:$0xff] }
 0x5e6   :  { %v853_v26 = vpop.eup %852 }
 0x5e7   :  { %378 = vrot.lane.b32.xlu1 %v853_v26, %s871_s4  ;;  %v693_v26 = vld [vmem:[%s1182_s11] sm:$0xff] }
 0x647   :  { %v384_v31 = vpop.permute.xlu0 %383 }
 0x659   :  { %v379_v29 = vpop.permute.xlu1 %378 }
 0x65a   :  { %v381_v30 = vmul.f32 %v379_v29, %v374_v28 }
 0x65c   :  { %v386_v32 = vsub.f32 %v381_v30, %v384_v31  ;;  %v578_v30 = vld [vmem:[%s1180_s8 + $0x8] sm:$0xff] }
 0x65e   :  { %388 = vrot.lane.b32.xlu1 %v386_v32, %s861_s28 }
 0x6d0   :  { %v389_v33 = vpop.permute.xlu1 %388 }
 0x6d1   :  { %391 = vrot.lane.b32.xlu0 %v389_v33, %s860_s27  ;;  %707 = vst.msk [vmem:[%s1176_s13] sm:$0xff] %vm705_vm8, %v389_v33 }
 0x743   :  { %v392_v34 = vpop.permute.xlu0 %391 }
 0x744   :  { %v393_v35 = vsel %vm55_vm0, %v392_v34, %v389_v33 }
 0x745   :  { %394 = vrot.lane.b32.xlu1 %v393_v35, %s860_s27 }
 0x7b7   :  { %v395_v36 = vpop.permute.xlu1 %394 }
 0x7b8   :  { %v396_v37 = vsel %vm55_vm0, %v395_v36, %v389_v33 }
 0x7b9   :  { %402 = vrot.lane.b32.xlu1 %v396_v37, %s872_s29  ;;  %398 = vrot.lane.b32.xlu0 %v396_v37, %s864_s14 }
 0x7bd   :  { %410 = vrot.lane.b32.xlu1 %v396_v37, %s865_s15  ;;  %406 = vrot.lane.b32.xlu0 %v396_v37, %s863_s30 }
 0x82b   :  { %v403_v38 = vpop.permute.xlu1 %402  ;;  %v399_v39 = vpop.permute.xlu0 %398 }
 0x82c   :  { %v401_v40 = vsel %vm47_vm1, %v389_v33, %v399_v39 }
 0x82d   :  { %v405_v42 = vsel %vm49_vm2, %v403_v38, %v401_v40 }
 0x82f   :  { %v411_v41 = vpop.permute.xlu1 %410  ;;  %v407_v43 = vpop.permute.xlu0 %406 }
 0x830   :  { %v409_v44 = vsel %vm48_vm3, %v407_v43, %v405_v42 }
 0x831   :  { %v413_v45 = vsel %vm50_vm4, %v411_v41, %v409_v44 }
 0x832   :  { %414 = vrot.lane.b32.xlu0 %v413_v45, %s860_s27 }
 0x8a4   :  { %v415_v46 = vpop.permute.xlu0 %414 }
 0x8a5   :  { %v416_v47 = vsel %vm55_vm0, %v415_v46, %v413_v45 }
 0x8a6   :  { %417 = vrot.lane.b32.xlu1 %v416_v47, %s860_s27 }
 0x918   :  { %v418_v48 = vpop.permute.xlu1 %417 }
 0x919   :  { %v419_v49 = vsel %vm55_vm0, %v418_v48, %v413_v45 }
 0x91a   :  { %424 = vrot.lane.b32.xlu1 %v419_v49, %s861_s28  ;;  %427 = vrot.lane.b32.xlu0 %v419_v49, %s868_s1 }
 0x91e   :  { %448 = vperm.xlu1 %847, %v435_v50   ;;  %421 = vrot.lane.b32.xlu0 %v419_v49, %s866_s16 }
 0x922   :  { %438 = vperm.xlu1 %847, %v433_v5   ;;  %443 = vperm.xlu0 %846, %v434_v51  }
 0x98c   :  { %v428_v52 = vpop.permute.xlu0 %427  ;;  %v425_v53 = vpop.permute.xlu1 %424 }
 0x98d   :  { %802 = vmatpush3.msra.mxu1 %v428_v52 }
 0x98e   :  { %803 = vmatprep.subr.mxu1 %v867_v21 }
 0x98f   :  { %804 = vmatpush3.msra.mxu1 %v425_v53 }
 0x990   :  { %805 = vmatprep.subr.mxu1 %v867_v21  ;;  %v422_v54 = vpop.permute.xlu0 %421 }
 0x991   :  { %806 = vmatpush3.msra.mxu1 %v422_v54 }
 0x992   :  { %807 = vmatprep.subr.mxu1 %v867_v21 }
 0x993   :  { %808 = vmatpush3.msra.mxu1 %v413_v45 }
 0x994   :  { %810 = vmatmul.mubr.msk.f32.vlgmr.msra.gmra.mxu1 %vm451_vm9, %v430_v55 }
 0x995   :  { %812 = vmatprep.mubr.msk.f32.mxu1 %vm869_vm5, %v867_v21 }
 0x998   :  { %813 = vmatmul.mubr.msk.f32.gmra.mxu1 %vm451_vm9, %v431_v56 }
 0x999   :  { %815 = vmatprep.mubr.msk.f32.mxu1 %vm869_vm5, %v867_v21  ;;  %v449_v1 = vpop.permute.xlu1 %448 }
 0x99c   :  { %816 = vmatmul.mubr.msk.f32.gmra.mxu1 %vm451_vm9, %v432_v57 }
 0x99d   :  { %v444_v60 = vpop.permute.xlu0 %443  ;;  %v439_v21 = vpop.permute.xlu1 %438 }
 0xa54   :  { %v527_v58 = vpop.f32.mrf.mxu1 }
 0xa55   :  { %v528_v8 = vadd.f32 %v527_v58, %v439_v21 }
 0xa56   :  { %v811_v59 = vpop.f32.mrf.mxu1 }
 0xa58   :  { %v532_v61 = vpop.f32.mrf.mxu1 }
 0xa59   :  { %v533_v62 = vadd.f32 %v532_v61, %v444_v60 }
 0xa5a   :  { %v814_v63 = vpop.f32.mrf.mxu1 }
 0xa5b   :  { %v542_v0 = vmax.f32 %v533_v62, 0.0 }
 0xa5c   :  { %v537_v2 = vpop.f32.mrf.mxu1 }
 0xa5d   :  { %v538_v3 = vadd.f32 %v537_v2, %v449_v1  ;;  %550 = vrot.lane.b32.xlu1 %v542_v0, %s860_s27 }
 0xa5e   :  { %v817_v6 = vpop.f32.mrf.mxu1 }
 0xa5f   :  { %v543_v7 = vmax.f32 %v538_v3, 0.0 }
 0xa61   :  { %553 = vrot.lane.b32.xlu0 %v543_v7, %s860_s27 }
 0xa65   :  { %547 = vrot.lane.b32.xlu0 %v528_v8, %s860_s27 }
 0xacf   :  { %v551_v9 = vpop.permute.xlu1 %550 }
 0xad0   :  { %v552_v10 = vsel %vm55_vm0, %v551_v9, %v542_v0 }
 0xad1   :  { %558 = vrot.lane.b32.xlu0 %v552_v10, %s860_s27 }
 0xad3   :  { %v554_v11 = vpop.permute.xlu0 %553 }
 0xad4   :  { %v555_v12 = vsel %vm55_vm0, %v554_v11, %v543_v7 }
 0xad5   :  { %560 = vrot.lane.b32.xlu1 %v555_v12, %s860_s27 }
 0xad7   :  { %v548_v13 = vpop.permute.xlu0 %547 }
 0xad8   :  { %v549_v14 = vsel %vm55_vm0, %v548_v13, %v528_v8 }
 0xad9   :  { %556 = vrot.lane.b32.xlu1 %v549_v14, %s860_s27 }
 0xb43   :  { %v559_v15 = vpop.permute.xlu0 %558 }
 0xb44   :  { %v563_v16 = vsel %vm55_vm0, %v559_v15, %v542_v0 }
 0xb45   :  { %570 = vrot.lane.b32.xlu1 %v563_v16, %s866_s16 }
 0xb47   :  { %v561_v19 = vpop.permute.xlu1 %560 }
 0xb48   :  { %v564_v20 = vsel %vm55_vm0, %v561_v19, %v543_v7 }
 0xb49   :  { %572 = vrot.lane.b32.xlu0 %v564_v20, %s866_s16  ;;  %583 = vperm.xlu1 %847, %v579_v17  }
 0xb4b   :  { %v557_v23 = vpop.permute.xlu1 %556 }
 0xb4c   :  { %v562_v24 = vsel %vm55_vm0, %v557_v23, %v528_v8 }
 0xb4d   :  { %568 = vrot.lane.b32.xlu0 %v562_v24, %s866_s16  ;;  %689 = vperm.xlu1 %847, %v686_v22  }
 0xb51   :  { %588 = vperm.xlu0 %846, %v580_v25   ;;  %696 = vperm.xlu1 %847, %v693_v26  }
 0xbb7   :  { %v571_v28 = vpop.permute.xlu1 %570 }
 0xbbb   :  { %v573_v27 = vpop.permute.xlu0 %572 }
 0xbbc   :  { %818 = vmatprep.subr.mxu0 %v573_v27 }
 0xbbd   :  { %819 = vmatpush3.msra.mxu0 %v573_v27 }
 0xbbe   :  { %820 = vmatprep.subr.mxu0 %v571_v28 }
 0xbbf   :  { %821 = vmatpush3.msra.mxu0 %v571_v28  ;;  %v569_v29 = vpop.permute.xlu0 %568 }
 0xbc0   :  { %822 = vmatprep.subr.mxu0 %v569_v29 }
 0xbc1   :  { %823 = vmatpush3.msra.mxu0 %v569_v29 }
 0xbc2   :  { %824 = vmatprep.subr.mxu0 %v543_v7 }
 0xbc3   :  { %825 = vmatpush3.msra.mxu0 %v543_v7 }
 0xbc4   :  { %826 = vmatprep.subr.mxu0 %v542_v0  ;;  %v584_v32 = vpop.permute.xlu1 %583 }
 0xbc5   :  { %827 = vmatpush3.msra.mxu0 %v542_v0 }
 0xbc6   :  { %828 = vmatprep.subr.mxu0 %v528_v8 }
 0xbc7   :  { %829 = vmatpush3.msra.mxu0 %v528_v8 }
 0xbc8   :  { %831 = vmatmul.mubr.msk.f32.vlgmr.msra.gmra.mxu0 %vm285_vm7, %v578_v30  ;;  %v690_v42 = vpop.permute.xlu1 %689 }
 0xbcc   :  { %v589_v37 = vpop.permute.xlu0 %588  ;;  %v697_v47 = vpop.permute.xlu1 %696 }
 0xc88   :  { %v832_v31 = vpop.f32.mrf.mxu0 }
 0xc89   :  { %v669_v38 = vadd.f32 %v832_v31, %v589_v37 }
 0xc8a   :  { %v663_v33 = vpop.f32.mrf.mxu0 }
 0xc8b   :  { %v664_v34 = vadd.f32 %v663_v33, %v584_v32 }
 0xc8d   :  { %854 = vtanh.f32 %v664_v34 }
 0xc9a   :  { %v855_v35 = vpop.eup %854 }
 0xc9b   :  { %v674_v36 = vmul.f32 1.442695, %v855_v35 }
 0xc9d   :  { %856 = vpow2.f32 %v674_v36 }
 0xc9e   :  { %858 = vtanh.f32 %v669_v38 }
 0xcaa   :  { %v857_v39 = vpop.eup %856 }
 0xcab   :  { %677 = vrot.lane.b32.xlu0 %v857_v39, %s871_s4  ;;  %v859_v40 = vpop.eup %858 }
 0xcaf   :  { %682 = vrot.lane.b32.xlu0 %v859_v40, %s871_s4 }
 0xd1d   :  { %v678_v41 = vpop.permute.xlu0 %677 }
 0xd1e   :  { %v680_v43 = vmul.f32 %v678_v41, %v950_v4 }
 0xd21   :  { %v683_v44 = vpop.permute.xlu0 %682 }
 0xd22   :  { %v685_v45 = vadd.f32 %v683_v44, %v680_v43 }
 0xd24   :  { %v692_v46 = vmul.f32 %v690_v42, %v685_v45 }
 0xd26   :  { %v699_v48 = vadd.f32 %v697_v47, %v692_v46 }
 0xd28   :  { %v700_v49 = vmax.f32 %v699_v48, 0.0 }
 0xd2a   :  { %702 = vrot.lane.b32.xlu1 %v700_v49, %s861_s28 }
 0xd9c   :  { %v703_v50 = vpop.permute.xlu1 %702 }
 0xd9d   :  { %706 = vst.msk [vmem:[%s1183_s12] sm:$0xff] %vm705_vm8, %v703_v50 }

</bundles_post_ra>
